<compile_context>
chip_gen: v7x
topology: tpu7x:2x2x1
jax: 0.10.0
libtpu: 0.0.40
codegen_flags: <defaults>
</compile_context>

<pallas_src>
import jax
import jax.numpy as jnp
from jax.experimental import pallas as pl
from jax.experimental.pallas import tpu as pltpu


def _pick_lane_block(hw, rows, itemsize):
    """Largest lane block (multiple of 128 dividing hw, or hw itself) whose
    double-buffered input block stays well under v7x's scoped-VMEM default."""
    budget = 8 * 1024 * 1024             # ~8 MiB per buffered input block
    col_bytes = rows * itemsize
    if hw * col_bytes <= budget:
        return hw                         # whole slab in one block, grid=(1,)
    cap = max(128, (budget // col_bytes) // 128 * 128)
    for t in range(cap, 0, -128):
        if hw % t == 0:
            return t
    return hw                             # fallback (raise vmem_limit if hit)


def _reduce_kernel(c0_ref, wrow_ref, x_ref, o_ref, acc_ref):
    j = pl.program_id(0)

    @pl.when(j == 0)
    def _init():
        acc_ref[...] = jnp.zeros_like(acc_ref)

    # Per-row lane sum of this block (XLU), then per-channel weighting (VPU).
    xsum = jnp.sum(x_ref[...], axis=-1, keepdims=True)        # (R, 1)
    acc_ref[...] = acc_ref[...] + jnp.sum(xsum * wrow_ref[...])

    @pl.when(j == pl.num_programs(0) - 1)
    def _finalize():
        o_ref[...] = acc_ref[...] + c0_ref[0]                  # + mean(bias)+7


@jax.jit
def model_forward(x_nchw, w_oihw, bias):
    N, Cin, H, W = x_nchw.shape
    Cout = w_oihw.shape[0]
    Hp, Wp = H + 2, W + 2                 # Conv2d(k=1, s=1, pad=1) output size
    # AvgPool2d(2) preserves the global mean only for even pooled dims (true
    # for the spec's 64x64 input).  TODO(synk): odd H/W would need PyTorch's
    # floor-truncating pool-window handling.
    assert Hp % 2 == 0 and Wp % 2 == 0, "mean-preserving AvgPool2d(2) needs even dims"

    R, HW = N * Cin, H * W
    x2 = x_nchw.reshape(R, HW)            # contiguous view: rows=(n,c), lanes=H*W

    # Fold Cout out: sum_{n,o,hw} conv = sum_c colsum(w)[c] * sum_{n,hw} x[n,c].
    denom = jnp.float32(N * Cout * Hp * Wp)
    wc = jnp.sum(w_oihw.reshape(Cout, Cin).astype(jnp.float32), axis=0)   # (Cin,)
    wrow = jnp.broadcast_to(wc / denom, (N, Cin)).reshape(R, 1)           # per-row weight
    c0 = (jnp.mean(bias.astype(jnp.float32)) + jnp.float32(7.0)).reshape(1)

    tl = _pick_lane_block(HW, R, x2.dtype.itemsize)
    grid = (HW // tl,)

    out = pl.pallas_call(
        _reduce_kernel,
        out_shape=jax.ShapeDtypeStruct((1, 1), jnp.float32),
        grid=grid,
        in_specs=[
            pl.BlockSpec(memory_space=pltpu.MemorySpace.SMEM),   # c0 scalar
            pl.BlockSpec((R, 1), lambda j: (0, 0)),              # wrow (resident)
            pl.BlockSpec((R, tl), lambda j: (0, j)),             # x lane blocks
        ],
        out_specs=pl.BlockSpec((1, 1), lambda j: (0, 0)),
        scratch_shapes=[pltpu.VMEM((1, 1), jnp.float32)],
        compiler_params=pltpu.CompilerParams(
            dimension_semantics=("arbitrary",)),                 # reduction axis
    )(c0, wrow, x2)
    return out[0, 0]


if __name__ == "__main__":
    key = jax.random.PRNGKey(0)
    kx, kw, kb = jax.random.split(key, 3)

    # Small shapes consistent with the module (Conv2d fixes Cin=3, Cout=8, k=1).
    N, Cin, H, W = 2, 3, 16, 16
    Cout = 8
    x = jax.random.normal(kx, (N, Cin, H, W), jnp.float32)
    w = jax.random.normal(kw, (Cout, Cin, 1, 1), jnp.float32) * 0.1
    b = jax.random.normal(kb, (Cout,), jnp.float32) * 0.1

    out = jax.block_until_ready(model_forward(x, w, b))

    # Pure-JAX reference for the full forward pass.
    x_pad = jnp.pad(x, ((0, 0), (0, 0), (1, 1), (1, 1)))
    v1 = jnp.einsum("nchw,oc->nohw", x_pad, w.reshape(Cout, Cin)) + b[None, :, None, None]
    v2 = (v1 + 7.0).reshape(N, Cout, (H + 2) // 2, 2, (W + 2) // 2, 2).mean(axis=(3, 5))
    ref = v2.mean()
    assert jnp.allclose(out, ref, rtol=1e-5, atol=1e-5), (float(out), float(ref))

    print("KERNEL_OK")
</pallas_src>

<mosaic_0001>
module attributes {stable_mosaic.version = 11 : i64} {
  func.func @_reduce_kernel(%arg0: i32, %arg1: memref<1xf32, #tpu.memory_space<smem>>, %arg2: memref<6x1xf32, #tpu.memory_space<vmem>>, %arg3: memref<6x256xf32, #tpu.memory_space<vmem>>, %arg4: memref<1x1xf32, #tpu.memory_space<vmem>>, %arg5: memref<1x1xf32, #tpu.memory_space<vmem>>) attributes {dimension_semantics = [#tpu.dimension_semantics<arbitrary>], iteration_bounds = array<i64: 1>, scalar_prefetch = 0 : i64, scratch_operands = 1 : i64, tpu.core_type = #tpu.core_type<tc>, window_params = [{transform_indices = @transform_0, window_bounds = array<i64: 1>}, {pipeline_mode = #tpu.pipeline_mode<synchronous>, transform_indices = @transform_1, window_bounds = array<i64: 6, 1>}, {transform_indices = @transform_2, window_bounds = array<i64: 6, 256>}, {pipeline_mode = #tpu.pipeline_mode<synchronous>, transform_indices = @transform_3, window_bounds = array<i64: 1, 1>}]} {
    %c0_i32 = arith.constant 0 : i32
    %0 = arith.cmpi eq, %arg0, %c0_i32 : i32
    %1 = arith.extui %0 : i1 to i32
    %c0_i32_0 = arith.constant 0 : i32
    %2 = arith.cmpi ne, %1, %c0_i32_0 : i32
    scf.if %2 {
      %cst_11 = arith.constant 0.000000e+00 : f32
      %19 = vector.broadcast %cst_11 : f32 to vector<1x1xf32>
      %c0_12 = arith.constant 0 : index
      %c0_13 = arith.constant 0 : index
      %20 = vector.load %arg5[%c0_12, %c0_13] : memref<1x1xf32, #tpu.memory_space<vmem>>, vector<1x1xf32>
      tpu.vector_store %arg5[%c0_12, %c0_13], %19 {strides = array<i32>} : memref<1x1xf32, #tpu.memory_space<vmem>>, vector<1x1xf32>,
    } else {
    }
    %c0 = arith.constant 0 : index
    %c0_1 = arith.constant 0 : index
    %3 = vector.load %arg3[%c0, %c0_1] : memref<6x256xf32, #tpu.memory_space<vmem>>, vector<6x256xf32>
    %cst = arith.constant dense<0.000000e+00> : vector<6xf32>
    %4 = vector.multi_reduction <add>, %3, %cst [1] : vector<6x256xf32> to vector<6xf32>
    %5 = vector.shape_cast %4 : vector<6xf32> to vector<6x1xf32>
    %c0_2 = arith.constant 0 : index
    %c0_3 = arith.constant 0 : index
    %6 = vector.load %arg5[%c0_2, %c0_3] : memref<1x1xf32, #tpu.memory_space<vmem>>, vector<1x1xf32>
    %c0_4 = arith.constant 0 : index
    %c0_5 = arith.constant 0 : index
    %7 = vector.load %arg2[%c0_4, %c0_5] : memref<6x1xf32, #tpu.memory_space<vmem>>, vector<6x1xf32>
    %8 = arith.mulf %5, %7 : vector<6x1xf32>
    %9 = vector.shape_cast %8 : vector<6x1xf32> to vector<1x6x1xf32>
    %cst_6 = arith.constant dense<0.000000e+00> : vector<1xf32>
    %10 = vector.multi_reduction <add>, %9, %cst_6 [1, 2] : vector<1x6x1xf32> to vector<1xf32>
    %11 = vector.shape_cast %10 : vector<1xf32> to vector<1x1x1xf32>
    %12 = vector.extract %11[0, 0, 0] : f32 from vector<1x1x1xf32>
    %13 = vector.broadcast %12 : f32 to vector<1x1xf32>
    %14 = arith.addf %6, %13 : vector<1x1xf32>
    %c0_7 = arith.constant 0 : index
    %c0_8 = arith.constant 0 : index
    %15 = vector.load %arg5[%c0_7, %c0_8] : memref<1x1xf32, #tpu.memory_space<vmem>>, vector<1x1xf32>
    tpu.vector_store %arg5[%c0_7, %c0_8], %14 {strides = array<i32>} : memref<1x1xf32, #tpu.memory_space<vmem>>, vector<1x1xf32>,
    %c0_i32_9 = arith.constant 0 : i32
    %16 = arith.cmpi eq, %arg0, %c0_i32_9 : i32
    %17 = arith.extui %16 : i1 to i32
    %c0_i32_10 = arith.constant 0 : i32
    %18 = arith.cmpi ne, %17, %c0_i32_10 : i32
    scf.if %18 {
      %c0_11 = arith.constant 0 : index
      %c0_12 = arith.constant 0 : index
      %19 = vector.load %arg5[%c0_11, %c0_12] : memref<1x1xf32, #tpu.memory_space<vmem>>, vector<1x1xf32>
      %c0_13 = arith.constant 0 : index
      %20 = memref.load %arg1[%c0_13] : memref<1xf32, #tpu.memory_space<smem>>
      %21 = vector.broadcast %20 : f32 to vector<1x1xf32>
      %22 = arith.addf %19, %21 : vector<1x1xf32>
      %c0_14 = arith.constant 0 : index
      %c0_15 = arith.constant 0 : index
      %23 = vector.load %arg4[%c0_14, %c0_15] : memref<1x1xf32, #tpu.memory_space<vmem>>, vector<1x1xf32>
      tpu.vector_store %arg4[%c0_14, %c0_15], %22 {strides = array<i32>} : memref<1x1xf32, #tpu.memory_space<vmem>>, vector<1x1xf32>,
    } else {
    }
    return
  }
  func.func @transform_0(%arg0: i32) -> i32 {
    %c0_i32 = arith.constant 0 : i32
    %c0_i32_0 = arith.constant 0 : i32
    return %c0_i32 : i32
  }
  func.func @transform_1(%arg0: i32) -> (i32, i32) {
    %c0_i32 = arith.constant 0 : i32
    %c0_i32_0 = arith.constant 0 : i32
    %c0_i32_1 = arith.constant 0 : i32
    return %c0_i32, %c0_i32_0 : i32, i32
  }
  func.func @transform_2(%arg0: i32) -> (i32, i32) {
    %c0_i32 = arith.constant 0 : i32
    %c0_i32_0 = arith.constant 0 : i32
    return %c0_i32, %arg0 : i32, i32
  }
  func.func @transform_3(%arg0: i32) -> (i32, i32) {
    %c0_i32 = arith.constant 0 : i32
    %c0_i32_0 = arith.constant 0 : i32
    %c0_i32_1 = arith.constant 0 : i32
    return %c0_i32, %c0_i32_0 : i32, i32
  }
}

</mosaic_0001>

<bundles_post_ra>
// kernel: model_forward.1
= control target key start
LH: loop header
LB: loop body
LE: loop exit
PB: predicated region body
PF: predicated region fallthrough
CT: control target
= control target key end

     0   :  { %vm24_vm0 = vcmask 1045504   ;;  %s147_s0 = inlined_call_operand.<no memory space> [shape: f32[1], index: 0, kind: input, shape index: {}]   ;;  %s148_s1 = inlined_call_operand.vmem [shape: f32[6,1], index: 1, kind: input, shape index: {}]   ;;  %s149_s2 = inlined_call_operand.vmem [shape: f32[6,256], index: 2, kind: input, shape index: {}]   ;;  %s150_s3 = inlined_call_operand.hbm [shape: f32[1,1], index: 3, kind: output, shape index: {}]  }
   0x1   :  { %v22_v0 = vld [vmem:[%s149_s2] sm:$0x3f]  ;;  %v23_v1 = vld [vmem:[%s149_s2 + $0x8] sm:$0x3f] }
   0x2   :  { %v25_v2 = vsel %vm24_vm0, %v22_v0, 0.0  ;;  %v26_v3 = vsel %vm24_vm0, %v23_v1, 0.0 }
   0x3   :  { %9 = vsyncpa [#allocation5], 0  ;;  %v27_v4 = vadd.f32 %v26_v3, %v25_v2  ;;  %v31_v5 = vld [vmem:[%s148_s1] sm:$0x3f]  ;;  %vm33_vm1 = vcmask 5120   ;;  %vm20_vm2 = vcmask 0   ;;  %v53_v20 = vstv %s147_s0 }
   0x4   :  { %v98_v9 = vmov 0.0   ;;  %s99_s19 = smov [#allocation4]  }
   0x5   :  { %28 = vadd.xlane.f32.xlu0 %v27_v4  ;;  %21 = vst.msk [vmem:[#allocation2] sm:$0x1] %vm20_vm2, %v98_v9  ;;  %s62_s20 = sshll.u32 %s99_s19, 4  ;;  %s63_s20 = int_to_ptr.vmem [resolvable:$true] %s62_s20 }
   0x6   :  { %s74_s21 = scalar_lea.vmem %s63_s20, 16  ;;  %s78_s22 = scalar_lea.vmem %s63_s20, 32 }
   0x7   :  { %p75_p0 = scmp.ne.s32.totalorder %s63_s20, %s74_s21  ;;  %p79_p1 = scmp.lt.s32.totalorder %s63_s20, %s63_s20 }
   0x8   :  { %p80_p2 = scmp.lt.s32.totalorder %s78_s22, %s74_s21 }
   0xa   :  { %p81_p3 = por %p80_p2, %p79_p1 }
   0xc   :  { %v30_v17 = vld [vmem:[#allocation2] sm:$0x1]  ;;  %p82_p4 = pnand %p81_p3, %p75_p0 }
  0x92   :  { %v29_v6 = vpop.xlane.xlu0 %28 }
  0x93   :  { %v32_v7 = vmul.f32 %v31_v5, %v29_v6 }
  0x95   :  { %v34_v8 = vsel %vm33_vm1, %v32_v7, 0.0 }
  0x96   :  { %35 = vadd.xlane.f32.xlu0 %v34_v8 }
 0x123   :  { %v36_v10 = vpop.xlane.xlu0 %35 }
 0x124   :  { %v37_v11 = vrot.slane %v36_v10, 4 }
 0x126   :  { %v38_v12 = vadd.f32 %v37_v11, %v36_v10 }
 0x128   :  { %v39_v13 = vrot.slane %v38_v12, 2 }
 0x12a   :  { %v40_v14 = vadd.f32 %v39_v13, %v38_v12 }
 0x12c   :  { %v41_v15 = vrot.slane %v40_v14, 1 }
 0x12e   :  { %v42_v16 = vadd.f32 %v41_v15, %v40_v14 }
 0x130   :  { %70 = vpush %v42_v16 }
 0x161   :  { %s71_s2 = spop %70 }
 0x162   :  { %v44_v18 = vstv %s71_s2 }
 0x163   :  { %v45_v19 = vadd.f32 %v44_v18, %v30_v17 }
 0x165   :  { %47 = vst.msk [vmem:[#allocation2] sm:$0x1] %vm20_vm2, %v45_v19 }
 0x16c   :  { %v51_v21 = vld [vmem:[#allocation2] sm:$0x1] }
 0x16d   :  { %v54_v22 = vadd.f32 %v53_v20, %v51_v21 }
 0x16f   :  { %55 = vst.msk [vmem:[#allocation4] sm:$0x1] %vm20_vm2, %v54_v22 }
 0x170   :  { %85 = shalt.err (!%p82_p4)
}
 0x171   :  { %s86_s25 = scalar_lea.hbm %s150_s3, 16 }
 0x172   :  { %p87_p5 = scmp.ne.s32.totalorder %s150_s3, %s86_s25  ;;  %p90_p6 = scmp.lt.u32.totalorder %s86_s25, %s150_s3 }
 0x174   :  { %p92_p7 = pnand %p90_p6, %p87_p5 }
 0x176   :  { %95 = shalt.err (!%p92_p7)
}
 0x177   :  { %65 = dma.vmem_to_hbm [thread:$0]  %s63_s20, 16, %s150_s3, [#allocation5]  }
 0x178   :  { %96 = dma.done.wait [#allocation5], 16  }
 0x179   :  { %97 = vsyncadd [#allocation5], 4294967280 }
 0x17a   :  { %69 = vsyncpa [#allocation5], 1 }

</bundles_post_ra>
